<compile_context>
chip_gen: v6e
topology: v6e:2x2x1
jax: 0.10.0
libtpu: 0.0.40
codegen_flags: <defaults>
</compile_context>

<pallas_src>
import functools

import jax
import jax.numpy as jnp
from jax.experimental import pallas as pl
from jax.experimental.pallas import tpu as pltpu


def _locked_dropout_kernel(bits_ref, x_ref, o_ref, *, threshold, inv_keep):
    # Bernoulli(keep_prob) keep-mask via integer threshold compare, pre-scaled
    # by 1/keep_prob (inverted dropout). Computed once per tile, then broadcast
    # over the batch axis (leading dim of the block).
    mask = jnp.where(
        bits_ref[...] < jnp.uint32(threshold),
        jnp.float32(inv_keep),
        jnp.float32(0.0),
    ).astype(o_ref.dtype)
    o_ref[...] = x_ref[...] * mask[None, :, :]


def _pick_lane_tile(h):
    # Lane-dense last-dim tile: large multiple of 128, else full dim (legal).
    for c in (512, 256, 128):
        if h % c == 0:
            return c
    return h


def _pick_sublane_tile(t, max_rows):
    for c in (512, 256, 128, 64, 32, 16, 8):
        if t % c == 0 and c <= max_rows:
            return c
    if t % 8 == 0:
        return 8
    return t  # full-dim block is always legal


def locked_dropout(x, seed, dropout=0.5, training=True):
    """LockedDropout forward. x: [batch, seq, hidden]; seed: int or PRNGKey."""
    if not training or dropout == 0.0:
        return x

    b, t, h = x.shape
    keep_prob = 1.0 - float(dropout)
    inv_keep = 1.0 / keep_prob
    # uint32 threshold for the Bernoulli compare (saturating near keep_prob=1).
    threshold = min(int(keep_prob * 4294967296.0), 4294967295)

    key = seed if isinstance(seed, jax.Array) else jax.random.PRNGKey(seed)
    # TODO(synk): on real TPU hardware the bits could be generated per-tile
    # in-kernel with pltpu.prng_seed(seed, program_id(0), program_id(1)) +
    # pltpu.prng_random_bits to skip this HBM stream; those primitives have no
    # interpret-mode lowering, so the shared [T, H] bits are drawn here.
    bits = jax.random.bits(key, shape=(t, h), dtype=jnp.uint32)

    tile_h = _pick_lane_tile(h)
    # Keep each (B, TILE_T, TILE_H) buffer around <= 2 MiB so the
    # double-buffered input + output tiles fit v7x's smaller scoped VMEM.
    bytes_per_row = b * tile_h * x.dtype.itemsize
    max_rows = max(8, (2 * 1024 * 1024) // max(bytes_per_row, 1))
    tile_t = _pick_sublane_tile(t, max_rows)

    grid = (t // tile_t, h // tile_h)

    kernel = functools.partial(
        _locked_dropout_kernel, threshold=threshold, inv_keep=inv_keep
    )

    return pl.pallas_call(
        kernel,
        out_shape=jax.ShapeDtypeStruct(x.shape, x.dtype),
        grid=grid,
        in_specs=[
            pl.BlockSpec((tile_t, tile_h), lambda ti, hi: (ti, hi)),        # bits
            pl.BlockSpec((b, tile_t, tile_h), lambda ti, hi: (0, ti, hi)),  # x
        ],
        out_specs=pl.BlockSpec((b, tile_t, tile_h), lambda ti, hi: (0, ti, hi)),
        compiler_params=pltpu.CompilerParams(
            dimension_semantics=("parallel", "parallel")
        ),
    )(bits, x)


if __name__ == "__main__":
    key = jax.random.PRNGKey(0)
    B, T, H = 2, 8, 128
    x = jax.random.normal(key, (B, T, H), dtype=jnp.float32)

    out = locked_dropout(x, seed=42, dropout=0.5, training=True)
    out = jax.block_until_ready(out)
    assert out.shape == x.shape and out.dtype == x.dtype

    # Mask is locked across the batch dim: the dropped positions are identical
    # for every batch element, and kept values equal x / keep_prob (= 2*x).
    expect = x * 2.0
    zero0 = jnp.isclose(out[0], 0.0, atol=1e-6)
    zero1 = jnp.isclose(out[1], 0.0, atol=1e-6)
    assert bool(jnp.all(zero0 == zero1))  # same mask across the batch
    assert bool(jnp.all(jnp.where(zero0, True,
                                  jnp.isclose(out[0], expect[0], rtol=1e-5))))
    assert bool(jnp.all(jnp.where(zero1, True,
                                  jnp.isclose(out[1], expect[1], rtol=1e-5))))
    # Non-degenerate mask (roughly half dropped).
    frac = float(jnp.mean(zero0.astype(jnp.float32)))
    assert 0.1 < frac < 0.9

    # Multi-tile grid path (T=24 -> TILE_T=8, H=384 -> TILE_H=128) in bf16.
    B2, T2, H2 = 4, 24, 384
    x2 = jax.random.normal(jax.random.PRNGKey(1), (B2, T2, H2), dtype=jnp.bfloat16)
    out2 = jax.block_until_ready(locked_dropout(x2, seed=7, dropout=0.3))
    assert out2.shape == x2.shape and out2.dtype == x2.dtype

    # eval mode / dropout=0 is a pass-through, as in the PyTorch module.
    assert bool(jnp.all(locked_dropout(x, seed=42, dropout=0.5, training=False) == x))
    assert bool(jnp.all(locked_dropout(x, seed=42, dropout=0.0, training=True) == x))

    print("KERNEL_OK")
</pallas_src>

<mosaic_0001>
module attributes {stable_mosaic.version = 11 : i64} {
  func.func @_locked_dropout_kernel(%arg0: i32, %arg1: i32, %arg2: memref<8x128xi32, #tpu.memory_space<vmem>>, %arg3: memref<2x8x128xf32, #tpu.memory_space<vmem>>, %arg4: memref<2x8x128xf32, #tpu.memory_space<vmem>>) attributes {dimension_semantics = [#tpu.dimension_semantics<parallel>, #tpu.dimension_semantics<parallel>], iteration_bounds = array<i64: 1, 1>, scalar_prefetch = 0 : i64, scratch_operands = 0 : i64, tpu.core_type = #tpu.core_type<tc>, window_params = [{transform_indices = @transform_0, window_bounds = array<i64: 8, 128>}, {transform_indices = @transform_1, window_bounds = array<i64: 2, 8, 128>}, {transform_indices = @transform_2, window_bounds = array<i64: 2, 8, 128>}]} {
    %c0 = arith.constant 0 : index
    %c0_0 = arith.constant 0 : index
    %0 = vector.load %arg2[%c0, %c0_0] : memref<8x128xi32, #tpu.memory_space<vmem>>, vector<8x128xi32>
    %c-2147483648_i32 = arith.constant -2147483648 : i32
    %1 = vector.broadcast %c-2147483648_i32 : i32 to vector<8x128xi32>
    %2 = arith.cmpi ult, %0, %1 : vector<8x128xi32>
    %cst = arith.constant 2.000000e+00 : f32
    %cst_1 = arith.constant 0.000000e+00 : f32
    %3 = vector.broadcast %cst : f32 to vector<8x128xf32>
    %4 = vector.broadcast %cst_1 : f32 to vector<8x128xf32>
    %5 = arith.select %2, %3, %4 : vector<8x128xi1>, vector<8x128xf32>
    %c0_2 = arith.constant 0 : index
    %c0_3 = arith.constant 0 : index
    %c0_4 = arith.constant 0 : index
    %6 = vector.load %arg3[%c0_2, %c0_3, %c0_4] : memref<2x8x128xf32, #tpu.memory_space<vmem>>, vector<2x8x128xf32>
    %7 = vector.shape_cast %5 : vector<8x128xf32> to vector<1x8x128xf32>
    %8 = vector.broadcast %7 : vector<1x8x128xf32> to vector<2x8x128xf32>
    %9 = arith.mulf %6, %8 : vector<2x8x128xf32>
    %c0_5 = arith.constant 0 : index
    %c0_6 = arith.constant 0 : index
    %c0_7 = arith.constant 0 : index
    %10 = vector.load %arg4[%c0_5, %c0_6, %c0_7] : memref<2x8x128xf32, #tpu.memory_space<vmem>>, vector<2x8x128xf32>
    tpu.vector_store %arg4[%c0_5, %c0_6, %c0_7], %9 {strides = array<i32>} : memref<2x8x128xf32, #tpu.memory_space<vmem>>, vector<2x8x128xf32>,
    return
  }
  func.func @transform_0(%arg0: i32, %arg1: i32) -> (i32, i32) {
    %c0_i32 = arith.constant 0 : i32
    return %arg0, %arg1 : i32, i32
  }
  func.func @transform_1(%arg0: i32, %arg1: i32) -> (i32, i32, i32) {
    %c0_i32 = arith.constant 0 : i32
    %c0_i32_0 = arith.constant 0 : i32
    return %c0_i32, %arg0, %arg1 : i32, i32, i32
  }
  func.func @transform_2(%arg0: i32, %arg1: i32) -> (i32, i32, i32) {
    %c0_i32 = arith.constant 0 : i32
    %c0_i32_0 = arith.constant 0 : i32
    return %c0_i32, %arg0, %arg1 : i32, i32, i32
  }
}

</mosaic_0001>

<bundles_post_ra>
// kernel: tpu_custom_call.1
= control target key start
LH: loop header
LB: loop body
LE: loop exit
PB: predicated region body
PF: predicated region fallthrough
CT: control target
= control target key end

     0   :  { %7 = vsyncpa [#allocation3], 0  ;;  %s173_s0 = inlined_call_operand.hbm [shape: u32[8,128], index: 0, kind: input, shape index: {}]   ;;  %s174_s1 = inlined_call_operand.hbm [shape: f32[2,8,128], index: 1, kind: input, shape index: {}]   ;;  %s175_s2 = inlined_call_operand.hbm [shape: f32[2,8,128], index: 2, kind: output, shape index: {}]  }
   0x1   :  { %8 = vsyncpa [#allocation6], 0 }
   0x2   :  { %9 = vsyncpa [#allocation4], 0  ;;  %s137_s9 = smov [#allocation2]   ;;  %s138_s11 = smov [#allocation5]  }
   0x3   :  { %s16_s10 = sshll.u32 %s137_s9, 4  ;;  %s25_s12 = sshll.u32 %s138_s11, 4  ;;  %s17_s10 = int_to_ptr.vmem [resolvable:$true] %s16_s10  ;;  %s26_s12 = int_to_ptr.vmem [resolvable:$true] %s25_s12 }
   0x4   :  { %s79_s13 = scalar_lea.vmem %s17_s10, 128  ;;  %p84_p1 = scmp.lt.s32.totalorder %s17_s10, %s17_s10 }
   0x5   :  { %p80_p0 = scmp.ne.s32.totalorder %s17_s10, %s79_s13  ;;  %p85_p2 = scmp.lt.s32.totalorder %s79_s13, %s79_s13 }
   0x7   :  { %p86_p3 = por %p85_p2, %p84_p1 }
   0x9   :  { %p87_p4 = pnand %p86_p3, %p80_p0 }
   0xb   :  { %90 = shalt.err (!%p87_p4)
}
   0xc   :  { %19 = dma.hbm_to_vmem [thread:$0]  %s173_s0, 128, %s17_s10, [#allocation3]  }
   0xd   :  { %s99_s16 = scalar_lea.vmem %s26_s12, 256  ;;  %p104_p6 = scmp.lt.s32.totalorder %s26_s12, %s26_s12 }
   0xe   :  { %p100_p5 = scmp.ne.s32.totalorder %s26_s12, %s99_s16  ;;  %p105_p7 = scmp.lt.s32.totalorder %s99_s16, %s99_s16 }
  0x10   :  { %p106_p8 = por %p105_p7, %p104_p6 }
  0x12   :  { %p107_p9 = pnand %p106_p8, %p100_p5 }
  0x14   :  { %110 = shalt.err (!%p107_p9)
}
  0x15   :  { %s139_s17 = smov 128   ;;  %s140_s18 = smov 8  }
  0x16   :  { %31 = dma.hbm_to_vmem [thread:$0]  %s174_s1, 256, %s26_s12, [#allocation6], %s139_s17, %s139_s17, %s140_s18  }
  0x17   :  { %131 = dma.done.wait [#allocation3], 128  }
  0x18   :  { %132 = vsyncadd [#allocation3], 4294967168 }
  0x19   :  { %133 = dma.done.wait [#allocation6], 256  }
  0x1a   :  { %134 = vsyncadd [#allocation6], 4294967040  ;;  %v38_v0 = vld [vmem:[#allocation2] sm:$0xff]  ;;  %v41_v1 = vld [vmem:[#allocation5] sm:$0xff]  ;;  %s141_s0 = smov [#allocation7]   ;;  %v142_v3 = vmov 0.0  }
  0x1b   :  { %v42_v2 = vld [vmem:[#allocation5 + $0x8] sm:$0xff]  ;;  %s52_s21 = sshll.u32 %s141_s0, 4  ;;  %vm39_vm0 = vcmp.lt.u32.totalorder %v38_v0, 2147483648  ;;  %s53_s21 = int_to_ptr.vmem [resolvable:$true] %s52_s21 }
  0x1c   :  { %v40_v4 = vsel %vm39_vm0, 2.0, %v142_v3  ;;  %s111_s22 = scalar_lea.vmem %s53_s21, 256  ;;  %p116_p11 = scmp.lt.s32.totalorder %s53_s21, %s53_s21 }
  0x1d   :  { %v43_v5 = vmul.f32 %v41_v1, %v40_v4  ;;  %v44_v6 = vmul.f32 %v42_v2, %v40_v4  ;;  %p112_p10 = scmp.ne.s32.totalorder %s53_s21, %s111_s22  ;;  %p117_p12 = scmp.lt.s32.totalorder %s111_s22, %s111_s22 }
  0x1f   :  { %45 = vst [vmem:[#allocation7] sm:$0xff] %v43_v5  ;;  %46 = vst [vmem:[#allocation7 + $0x8] sm:$0xff] %v44_v6  ;;  %p118_p13 = por %p117_p12, %p116_p11 }
  0x21   :  { %p119_p0 = pnand %p118_p13, %p112_p10 }
  0x23   :  { %122 = shalt.err (!%p119_p0)
}
  0x24   :  { %58 = dma.vmem_to_hbm [thread:$0]  %s53_s21, 256, %s175_s2, [#allocation4], %s139_s17, %s139_s17, %s140_s18  }
  0x25   :  { %135 = dma.done.wait [#allocation4], 256  }
  0x26   :  { %136 = vsyncadd [#allocation4], 4294967040 }
  0x27   :  { %62 = vsyncpa [#allocation3], 1 }
  0x28   :  { %63 = vsyncpa [#allocation6], 1 }
  0x29   :  { %64 = vsyncpa [#allocation4], 1 }

</bundles_post_ra>
